<compile_context>
chip_gen: v5e
topology: v5e:2x2
jax: 0.10.0
libtpu: 0.0.40
codegen_flags: <defaults>
</compile_context>

<pallas_src>
import functools
import math

import jax
import jax.numpy as jnp
from jax.experimental import pallas as pl
from jax.experimental.pallas import tpu as pltpu

_LANE = 128          # lane width (last dim alignment)
_SUBLANE_BF16 = 16   # bf16 sublane packing (second-minor alignment)


def _round_up(x, m):
    return ((x + m - 1) // m) * m


def _pick_tile(dim, candidates):
    """Largest candidate that divides `dim` (dim is a multiple of 128)."""
    for c in candidates:
        if c <= dim and dim % c == 0:
            return c
    return dim


# ----------------------------------------------------------------------------
# Parameter preparation (hoisted out of the forward pass).
# ----------------------------------------------------------------------------
def prepare_mlp_params(params, compute_dtype=jnp.bfloat16):
    """Pre-cast (bf16) and zero-pad weights/biases to lane-aligned shapes ONCE.

    params: list of (w [in, out] f32, b [out] f32)  (torch layout transposed).
    Returns (layers, out_features) with layers = [(w_pad [Kp,Np], b_pad [1,Np])].
    Zero padding is exact for matmul + bias + ReLU.
    """
    layers = []
    for w, b in params:
        K, N = w.shape
        Kp, Np = _round_up(K, _LANE), _round_up(N, _LANE)
        wp = w.astype(compute_dtype)
        if (Kp, Np) != (K, N):
            wp = jnp.pad(wp, ((0, Kp - K), (0, Np - N)))
        bp = b.astype(jnp.float32)
        if Np != N:
            bp = jnp.pad(bp, (0, Np - N))
        layers.append((wp, bp.reshape(1, Np)))
    out_features = params[-1][0].shape[1]
    return layers, out_features


# ----------------------------------------------------------------------------
# Fused whole-MLP kernel: grid over M only, weights VMEM-resident.
# ----------------------------------------------------------------------------
def _fused_mlp_kernel(*refs, num_layers, compute_dtype):
    # refs = (x_ref, w0, b0, w1, b1, ..., w_{L-1}, b_{L-1}, o_ref)
    x_ref = refs[0]
    o_ref = refs[-1]
    h = x_ref[...]                                   # (tm, K0p) bf16
    for i in range(num_layers):
        w_ref = refs[1 + 2 * i]                      # (Kp_i, Np_i) bf16
        b_ref = refs[2 + 2 * i]                      # (1, Np_i)   f32
        y = jnp.dot(h, w_ref[...], preferred_element_type=jnp.float32)
        y = y + b_ref[...]                           # f32 epilogue, bias bcast
        if i < num_layers - 1:
            h = jnp.maximum(y, 0.0).astype(compute_dtype)   # ReLU, stay in VMEM
        else:
            # TODO(synk): normalization layers are not fused; BaseMLP2 always
            # passes normalization=None so none is needed here.
            o_ref[...] = y.astype(o_ref.dtype)


def _fused_mlp_forward(xp, layers, out_dtype, *, tm, vmem_limit_bytes):
    Mp, K0p = xp.shape
    num_layers = len(layers)
    Np_last = layers[-1][0].shape[1]

    operands = [xp]
    in_specs = [pl.BlockSpec((tm, K0p), lambda m: (m, 0))]
    flops = 0
    bytes_accessed = Mp * K0p * xp.dtype.itemsize
    for wp, b2 in layers:
        Kp, Np = wp.shape
        operands += [wp, b2]
        # Constant block index -> Pallas keeps W/b VMEM-resident across the
        # whole M grid (no re-DMA per M tile).
        in_specs += [pl.BlockSpec((Kp, Np), lambda m: (0, 0)),
                     pl.BlockSpec((1, Np), lambda m: (0, 0))]
        flops += 2 * Mp * Kp * Np
        bytes_accessed += Kp * Np * wp.dtype.itemsize + Np * 4
    bytes_accessed += Mp * Np_last * jnp.dtype(out_dtype).itemsize

    kernel = functools.partial(_fused_mlp_kernel, num_layers=num_layers,
                               compute_dtype=xp.dtype)
    return pl.pallas_call(
        kernel,
        out_shape=jax.ShapeDtypeStruct((Mp, Np_last), out_dtype),
        grid_spec=pltpu.PrefetchScalarGridSpec(
            num_scalar_prefetch=0,
            grid=(Mp // tm,),
            in_specs=in_specs,
            out_specs=pl.BlockSpec((tm, Np_last), lambda m: (m, 0)),
        ),
        compiler_params=pltpu.CompilerParams(
            dimension_semantics=("parallel",),
            vmem_limit_bytes=vmem_limit_bytes,
        ),
        cost_estimate=pl.CostEstimate(flops=flops, transcendentals=0,
                                      bytes_accessed=bytes_accessed),
    )(*operands)


# ----------------------------------------------------------------------------
# Fallback: per-layer tiled matmul (only when the fused footprint is too big).
# ----------------------------------------------------------------------------
def _linear_kernel(x_ref, w_ref, b_ref, o_ref, acc_ref, *, activation):
    # x_ref: (tm, tk) bf16, w_ref: (tk, tn) bf16, b_ref: (1, tn) f32,
    # o_ref: (tm, tn), acc_ref: (tm, tn) f32 scratch resident across K.
    k = pl.program_id(2)

    @pl.when(k == 0)
    def _():
        # Initialize the accumulator with the broadcast bias: drops the
        # epilogue add entirely.
        acc_ref[...] = jnp.broadcast_to(b_ref[...], acc_ref.shape)

    acc_ref[...] += jnp.dot(x_ref[...], w_ref[...],
                            preferred_element_type=jnp.float32)

    @pl.when(k == pl.num_programs(2) - 1)
    def _():
        y = acc_ref[...]
        if activation == "relu":
            y = jnp.maximum(y, 0.0)
        o_ref[...] = y.astype(o_ref.dtype)


def _linear_padded(xp, wp, b2, *, activation, out_dtype, tm,
                   resident_w_budget=24 << 20):
    """One padded Linear layer: y = xp @ wp + b2 (+ optional ReLU).

    Operands are pre-padded / pre-cast; the output stays padded (no slicing
    between layers).
    """
    if activation not in (None, "relu"):
        raise ValueError(f"unsupported activation: {activation!r}")
    Mp, Kp = xp.shape
    Kp2, Np = wp.shape
    assert Kp == Kp2 and b2.shape == (1, Np)

    x_item = xp.dtype.itemsize
    w_item = wp.dtype.itemsize
    o_item = jnp.dtype(out_dtype).itemsize

    w_bytes = wp.size * w_item
    if 2 * w_bytes <= resident_w_budget:
        # Whole weight VMEM-resident: W is DMA'd once and reused for every M
        # tile; the single K step also removes the accumulator RMW loop.
        tk, tn = Kp, Np
    else:
        tk = _pick_tile(Kp, (1024, 512, 256, 128))
        tn = _pick_tile(Np, (512, 256, 128))

    def _footprint(tm_, tk_, tn_):
        return (2 * tm_ * tk_ * x_item + 2 * tk_ * tn_ * w_item
                + 2 * tm_ * tn_ * o_item + tm_ * tn_ * 4 + 2 * tn_ * 4)

    # Keep total VMEM under ~40 MiB (safe on every generation incl. v7x).
    while _footprint(tm, tk, tn) > (40 << 20) and tm >= 32:
        tm //= 2
    if _footprint(tm, tk, tn) > (40 << 20):
        tk = _pick_tile(Kp, (1024, 512, 256, 128))
        tn = _pick_tile(Np, (512, 256, 128))
        while _footprint(tm, tk, tn) > (40 << 20) and tk > 128:
            tk //= 2
    vmem_limit = (48 << 20) if _footprint(tm, tk, tn) > (24 << 20) else None

    grid = (Mp // tm, Np // tn, Kp // tk)
    grid_m, grid_n, _ = grid

    cost = pl.CostEstimate(
        flops=2 * Mp * Np * Kp,
        transcendentals=0,
        bytes_accessed=(Mp * Kp * x_item * grid_n      # x re-read per N tile
                        + Kp * Np * w_item * grid_m    # w re-read per M tile
                        + Np * 4 * grid_m              # bias
                        + Mp * Np * o_item),           # output
    )

    kernel = functools.partial(_linear_kernel, activation=activation)
    return pl.pallas_call(
        kernel,
        out_shape=jax.ShapeDtypeStruct((Mp, Np), out_dtype),
        grid_spec=pltpu.PrefetchScalarGridSpec(
            num_scalar_prefetch=0,
            grid=grid,
            in_specs=[
                pl.BlockSpec((tm, tk), lambda i, j, k: (i, k)),   # x tile
                pl.BlockSpec((tk, tn), lambda i, j, k: (k, j)),   # w tile
                pl.BlockSpec((1, tn), lambda i, j, k: (0, j)),    # bias slice
            ],
            out_specs=pl.BlockSpec((tm, tn), lambda i, j, k: (i, j)),
            scratch_shapes=[pltpu.VMEM((tm, tn), jnp.float32)],
        ),
        compiler_params=pltpu.CompilerParams(
            dimension_semantics=("parallel", "parallel", "arbitrary"),
            vmem_limit_bytes=vmem_limit,
        ),
        cost_estimate=cost,
    )(xp, wp, b2)


# ----------------------------------------------------------------------------
# Full BaseMLP2 forward.
# ----------------------------------------------------------------------------
def base_mlp2_pallas(x, prepared, *, compute_dtype=jnp.bfloat16,
                     tm=256, fused_vmem_budget=40 << 20):
    """BaseMLP2 forward.  `prepared` comes from prepare_mlp_params(params)."""
    layers, out_features = prepared
    M, K0 = x.shape
    K0p = layers[0][0].shape[0]
    assert K0 <= K0p
    out_dtype = x.dtype

    # Single cast + zero-pad of the input (weights were padded at prep time).
    tm = min(tm, _round_up(M, _SUBLANE_BF16))
    Mp = _round_up(M, tm)
    xp = x.astype(compute_dtype)
    if (Mp, K0p) != (M, K0):
        xp = jnp.pad(xp, ((0, Mp - M), (0, K0p - K0)))

    Np_last = layers[-1][0].shape[1]
    w_bytes = sum(w.size * w.dtype.itemsize + b.size * b.dtype.itemsize
                  for w, b in layers)
    max_np = max(w.shape[1] for w, _ in layers)
    fused_bytes = (2 * w_bytes                                          # resident W/b (2-buffered)
                   + 2 * tm * K0p * jnp.dtype(compute_dtype).itemsize   # x tiles
                   + 2 * tm * Np_last * jnp.dtype(out_dtype).itemsize   # out tiles
                   + 4 * tm * max_np * 4)                               # in-flight activations

    if fused_bytes <= fused_vmem_budget:
        vmem_limit = (48 << 20) if fused_bytes > (24 << 20) else None
        out_p = _fused_mlp_forward(xp, layers, out_dtype, tm=tm,
                                   vmem_limit_bytes=vmem_limit)
    else:
        # Per-layer fallback: bf16 padded activations flow between layers.
        h = xp
        n = len(layers)
        for i, (wp, b2) in enumerate(layers):
            last = i == n - 1
            h = _linear_padded(h, wp, b2,
                               activation=None if last else "relu",
                               out_dtype=out_dtype if last else compute_dtype,
                               tm=tm)
        out_p = h

    # Single slice after the last layer.
    return out_p[:M, :out_features]


# ----------------------------------------------------------------------------
# Reference (matched precision: bf16 matmuls, f32 accumulate, bf16 hidden).
# ----------------------------------------------------------------------------
def base_mlp2_ref(x, params, *, compute_dtype=jnp.bfloat16):
    n = len(params)
    h = x
    for i, (w, b) in enumerate(params):
        y = jnp.dot(h.astype(compute_dtype), w.astype(compute_dtype),
                    preferred_element_type=jnp.float32) + b.astype(jnp.float32)
        if i < n - 1:
            h = jnp.maximum(y, 0.0).astype(compute_dtype)
        else:
            h = y.astype(x.dtype)
    return h


# ----------------------------------------------------------------------------
# Init (matches torch.nn.Linear default init; weights stored [in, out]).
# ----------------------------------------------------------------------------
def init_linear_params(key, in_features, out_features):
    kw, kb = jax.random.split(key)
    bound = 1.0 / math.sqrt(in_features)
    w = jax.random.uniform(kw, (in_features, out_features), jnp.float32,
                           -bound, bound)
    b = jax.random.uniform(kb, (out_features,), jnp.float32, -bound, bound)
    return w, b


def init_base_mlp2_params(key, in_channels, out_channels, hidden_layers,
                          hidden_neurons):
    keys = jax.random.split(key, hidden_layers)
    params = []
    for i in range(hidden_layers):
        in_i = in_channels if i == 0 else hidden_neurons
        out_i = out_channels if i == hidden_layers - 1 else hidden_neurons
        params.append(init_linear_params(keys[i], in_i, out_i))
    return params


if __name__ == "__main__":
    key = jax.random.PRNGKey(0)
    k_x, k_p, k_x2, k_p2 = jax.random.split(key, 4)

    # Case 1: small shapes consistent with the module spec.
    batch, in_channels, out_channels = 8, 32, 16
    hidden_layers, hidden_neurons = 3, 64

    x = jax.random.normal(k_x, (batch, in_channels), jnp.float32)
    params = init_base_mlp2_params(k_p, in_channels, out_channels,
                                   hidden_layers, hidden_neurons)
    prepared = prepare_mlp_params(params)   # cast/pad hoisted out of forward

    fwd = jax.jit(lambda inp: base_mlp2_pallas(inp, prepared))
    y = jax.block_until_ready(fwd(x))
    y_ref = base_mlp2_ref(x, params)
    assert y.shape == (batch, out_channels)
    assert jnp.allclose(y, y_ref, atol=1e-2, rtol=1e-2), float(
        jnp.max(jnp.abs(y - y_ref)))

    # Case 2: exercises multiple M tiles (grid > 1) in the fused kernel.
    batch2, in2, out2, hl2, hn2 = 300, 48, 24, 2, 96
    x2 = jax.random.normal(k_x2, (batch2, in2), jnp.float32)
    params2 = init_base_mlp2_params(k_p2, in2, out2, hl2, hn2)
    prepared2 = prepare_mlp_params(params2)
    y2 = jax.block_until_ready(
        jax.jit(lambda inp: base_mlp2_pallas(inp, prepared2))(x2))
    y2_ref = base_mlp2_ref(x2, params2)
    assert y2.shape == (batch2, out2)
    assert jnp.allclose(y2, y2_ref, atol=1e-2, rtol=1e-2), float(
        jnp.max(jnp.abs(y2 - y2_ref)))

    print("KERNEL_OK")
</pallas_src>

<mosaic_0001>
module attributes {stable_mosaic.version = 11 : i64} {
  func.func @_fused_mlp_kernel(%arg0: i32, %arg1: memref<16x128xbf16, #tpu.memory_space<vmem>>, %arg2: memref<128x128xbf16, #tpu.memory_space<vmem>>, %arg3: memref<1x128xf32, #tpu.memory_space<vmem>>, %arg4: memref<128x128xbf16, #tpu.memory_space<vmem>>, %arg5: memref<1x128xf32, #tpu.memory_space<vmem>>, %arg6: memref<128x128xbf16, #tpu.memory_space<vmem>>, %arg7: memref<1x128xf32, #tpu.memory_space<vmem>>, %arg8: memref<16x128xf32, #tpu.memory_space<vmem>>) attributes {dimension_semantics = [#tpu.dimension_semantics<parallel>], iteration_bounds = array<i64: 1>, scalar_prefetch = 0 : i64, scratch_operands = 0 : i64, tpu.core_type = #tpu.core_type<tc>, window_params = [{transform_indices = @transform_0, window_bounds = array<i64: 16, 128>}, {pipeline_mode = #tpu.pipeline_mode<synchronous>, transform_indices = @transform_1, window_bounds = array<i64: 128, 128>}, {pipeline_mode = #tpu.pipeline_mode<synchronous>, transform_indices = @transform_2, window_bounds = array<i64: 1, 128>}, {pipeline_mode = #tpu.pipeline_mode<synchronous>, transform_indices = @transform_3, window_bounds = array<i64: 128, 128>}, {pipeline_mode = #tpu.pipeline_mode<synchronous>, transform_indices = @transform_4, window_bounds = array<i64: 1, 128>}, {pipeline_mode = #tpu.pipeline_mode<synchronous>, transform_indices = @transform_5, window_bounds = array<i64: 128, 128>}, {pipeline_mode = #tpu.pipeline_mode<synchronous>, transform_indices = @transform_6, window_bounds = array<i64: 1, 128>}, {transform_indices = @transform_7, window_bounds = array<i64: 16, 128>}]} {
    %c0 = arith.constant 0 : index
    %c0_0 = arith.constant 0 : index
    %0 = vector.load %arg1[%c0, %c0_0] : memref<16x128xbf16, #tpu.memory_space<vmem>>, vector<16x128xbf16>
    %c0_1 = arith.constant 0 : index
    %c0_2 = arith.constant 0 : index
    %1 = vector.load %arg2[%c0_1, %c0_2] : memref<128x128xbf16, #tpu.memory_space<vmem>>, vector<128x128xbf16>
    %cst = arith.constant dense<0.000000e+00> : vector<16x128xf32>
    %2 = tpu.matmul %0, %1, %cst {dimension_numbers = #tpu.dot_dimension_numbers<[1], [0], [0], [1], [0, 0, 1, 1], [], []>} : vector<16x128xbf16>, vector<128x128xbf16>, vector<16x128xf32> -> vector<16x128xf32>
    %c0_3 = arith.constant 0 : index
    %c0_4 = arith.constant 0 : index
    %3 = vector.load %arg3[%c0_3, %c0_4] : memref<1x128xf32, #tpu.memory_space<vmem>>, vector<1x128xf32>
    %4 = vector.broadcast %3 : vector<1x128xf32> to vector<16x128xf32>
    %5 = arith.addf %2, %4 : vector<16x128xf32>
    %cst_5 = arith.constant 0.000000e+00 : f32
    %6 = vector.broadcast %cst_5 : f32 to vector<16x128xf32>
    %7 = arith.maximumf %5, %6 : vector<16x128xf32>
    %8 = arith.truncf %7 : vector<16x128xf32> to vector<16x128xbf16>
    %c0_6 = arith.constant 0 : index
    %c0_7 = arith.constant 0 : index
    %9 = vector.load %arg4[%c0_6, %c0_7] : memref<128x128xbf16, #tpu.memory_space<vmem>>, vector<128x128xbf16>
    %cst_8 = arith.constant dense<0.000000e+00> : vector<16x128xf32>
    %10 = tpu.matmul %8, %9, %cst_8 {dimension_numbers = #tpu.dot_dimension_numbers<[1], [0], [0], [1], [0, 0, 1, 1], [], []>} : vector<16x128xbf16>, vector<128x128xbf16>, vector<16x128xf32> -> vector<16x128xf32>
    %c0_9 = arith.constant 0 : index
    %c0_10 = arith.constant 0 : index
    %11 = vector.load %arg5[%c0_9, %c0_10] : memref<1x128xf32, #tpu.memory_space<vmem>>, vector<1x128xf32>
    %12 = vector.broadcast %11 : vector<1x128xf32> to vector<16x128xf32>
    %13 = arith.addf %10, %12 : vector<16x128xf32>
    %cst_11 = arith.constant 0.000000e+00 : f32
    %14 = vector.broadcast %cst_11 : f32 to vector<16x128xf32>
    %15 = arith.maximumf %13, %14 : vector<16x128xf32>
    %16 = arith.truncf %15 : vector<16x128xf32> to vector<16x128xbf16>
    %c0_12 = arith.constant 0 : index
    %c0_13 = arith.constant 0 : index
    %17 = vector.load %arg6[%c0_12, %c0_13] : memref<128x128xbf16, #tpu.memory_space<vmem>>, vector<128x128xbf16>
    %cst_14 = arith.constant dense<0.000000e+00> : vector<16x128xf32>
    %18 = tpu.matmul %16, %17, %cst_14 {dimension_numbers = #tpu.dot_dimension_numbers<[1], [0], [0], [1], [0, 0, 1, 1], [], []>} : vector<16x128xbf16>, vector<128x128xbf16>, vector<16x128xf32> -> vector<16x128xf32>
    %c0_15 = arith.constant 0 : index
    %c0_16 = arith.constant 0 : index
    %19 = vector.load %arg7[%c0_15, %c0_16] : memref<1x128xf32, #tpu.memory_space<vmem>>, vector<1x128xf32>
    %20 = vector.broadcast %19 : vector<1x128xf32> to vector<16x128xf32>
    %21 = arith.addf %18, %20 : vector<16x128xf32>
    %c0_17 = arith.constant 0 : index
    %c0_18 = arith.constant 0 : index
    %22 = vector.load %arg8[%c0_17, %c0_18] : memref<16x128xf32, #tpu.memory_space<vmem>>, vector<16x128xf32>
    tpu.vector_store %arg8[%c0_17, %c0_18], %21 {strides = array<i32>} : memref<16x128xf32, #tpu.memory_space<vmem>>, vector<16x128xf32>,
    return
  }
  func.func @transform_0(%arg0: i32) -> (i32, i32) {
    %c0_i32 = arith.constant 0 : i32
    %c0_i32_0 = arith.constant 0 : i32
    return %arg0, %c0_i32 : i32, i32
  }
  func.func @transform_1(%arg0: i32) -> (i32, i32) {
    %c0_i32 = arith.constant 0 : i32
    %c0_i32_0 = arith.constant 0 : i32
    %c0_i32_1 = arith.constant 0 : i32
    return %c0_i32, %c0_i32_0 : i32, i32
  }
  func.func @transform_2(%arg0: i32) -> (i32, i32) {
    %c0_i32 = arith.constant 0 : i32
    %c0_i32_0 = arith.constant 0 : i32
    %c0_i32_1 = arith.constant 0 : i32
    return %c0_i32, %c0_i32_0 : i32, i32
  }
  func.func @transform_3(%arg0: i32) -> (i32, i32) {
    %c0_i32 = arith.constant 0 : i32
    %c0_i32_0 = arith.constant 0 : i32
    %c0_i32_1 = arith.constant 0 : i32
    return %c0_i32, %c0_i32_0 : i32, i32
  }
  func.func @transform_4(%arg0: i32) -> (i32, i32) {
    %c0_i32 = arith.constant 0 : i32
    %c0_i32_0 = arith.constant 0 : i32
    %c0_i32_1 = arith.constant 0 : i32
    return %c0_i32, %c0_i32_0 : i32, i32
  }
  func.func @transform_5(%arg0: i32) -> (i32, i32) {
    %c0_i32 = arith.constant 0 : i32
    %c0_i32_0 = arith.constant 0 : i32
    %c0_i32_1 = arith.constant 0 : i32
    return %c0_i32, %c0_i32_0 : i32, i32
  }
  func.func @transform_6(%arg0: i32) -> (i32, i32) {
    %c0_i32 = arith.constant 0 : i32
    %c0_i32_0 = arith.constant 0 : i32
    %c0_i32_1 = arith.constant 0 : i32
    return %c0_i32, %c0_i32_0 : i32, i32
  }
  func.func @transform_7(%arg0: i32) -> (i32, i32) {
    %c0_i32 = arith.constant 0 : i32
    %c0_i32_0 = arith.constant 0 : i32
    return %arg0, %c0_i32 : i32, i32
  }
}

</mosaic_0001>

<bundles_post_ra>
// kernel: _lambda_.1
= control target key start
LH: loop header
LB: loop body
LE: loop exit
PB: predicated region body
PF: predicated region fallthrough
CT: control target
= control target key end

     0   :  { %12 = vsyncpa [#allocation3], 0  ;;  %s622_s0 = inlined_call_operand.vmem [shape: bf16[16,128], index: 0, kind: input, shape index: {}]   ;;  %s623_s1 = inlined_call_operand.hbm [shape: bf16[128,128], index: 1, kind: input, shape index: {}]   ;;  %s624_s2 = inlined_call_operand.vmem [shape: f32[1,128], index: 2, kind: input, shape index: {}]   ;;  %s625_s3 = inlined_call_operand.hbm [shape: bf16[128,128], index: 3, kind: input, shape index: {}]   ;;  %s626_s4 = inlined_call_operand.vmem [shape: f32[1,128], index: 4, kind: input, shape index: {}]   ;;  %s627_s5 = inlined_call_operand.hbm [shape: bf16[128,128], index: 5, kind: input, shape index: {}]   ;;  %s628_s6 = inlined_call_operand.vmem [shape: f32[1,128], index: 6, kind: input, shape index: {}]   ;;  %s629_s7 = inlined_call_operand.vmem [shape: f32[16,128], index: 7, kind: output, shape index: {}]  }
   0x1   :  { %13 = vsyncpa [#allocation5], 0  ;;  %s35_s26 = sshll.u32 %s625_s3, 4  ;;  %s550_s27 = smov [#allocation4]   ;;  %s36_s26 = int_to_ptr.hbm [resolvable:$true] %s35_s26 }
   0x2   :  { %s37_s28 = sshll.u32 %s550_s27, 4  ;;  %s20_s8 = sshll.u32 %s623_s1, 4  ;;  %s38_s28 = int_to_ptr.vmem [resolvable:$true] %s37_s28  ;;  %s21_s8 = int_to_ptr.hbm [resolvable:$true] %s20_s8 }
   0x3   :  { %s551_s9 = smov 64   ;;  %s552_s10 = smov 4  }
   0x4   :  { %43 = dma.hbm_to_vmem [thread:$0]  %s36_s26, 1024, %s38_s28, [#allocation5], %s551_s9, %s551_s9, %s552_s10  }
   0x5   :  { %s553_s11 = smov [#allocation2]   ;;  %s50_s15 = sshll.u32 %s627_s5, 4  ;;  %s51_s15 = int_to_ptr.hbm [resolvable:$true] %s50_s15 }
   0x6   :  { %s22_s12 = sshll.u32 %s553_s11, 4  ;;  %s554_s3 = smov [#allocation6]   ;;  %s23_s12 = int_to_ptr.vmem [resolvable:$true] %s22_s12 }
   0x7   :  { %28 = dma.hbm_to_vmem [thread:$0]  %s21_s8, 1024, %s23_s12, [#allocation3], %s551_s9, %s551_s9, %s552_s10  }
   0x8   :  { %s52_s16 = sshll.u32 %s554_s3, 4  ;;  %s53_s16 = int_to_ptr.vmem [resolvable:$true] %s52_s16 }
   0x9   :  { %58 = dma.hbm_to_vmem [thread:$0]  %s51_s15, 1024, %s53_s16, [#allocation5], %s551_s9, %s551_s9, %s552_s10  }
   0xa   :  { %546 = dma.done.wait [#allocation3], 1024  }
   0xb   :  { %547 = vsyncadd [#allocation3], 4294966272 }
   0xc   :  { %548 = dma.done.wait [#allocation5], 2048  }
   0xd   :  { %549 = vsyncadd [#allocation5], 4294965248  ;;  %v449_v0 = vld [vmem:[#allocation2 + $0x38] sm:$0xff]  ;;  %v448_v1 = vld [vmem:[#allocation2 + $0x30] sm:$0xff] }
   0xe   :  { %149 = vmatpush.bf16.msra.mxu0 %v449_v0  ;;  %v457_v2 = vld [vmem:[#allocation4 + $0x38] sm:$0xff]  ;;  %v456_v3 = vld [vmem:[#allocation4 + $0x30] sm:$0xff]  ;;  %v447_v4 = vld [vmem:[#allocation2 + $0x28] sm:$0xff] }
   0xf   :  { %234 = vmatpush.bf16.msra.mxu1 %v457_v2  ;;  %v455_v5 = vld [vmem:[#allocation4 + $0x28] sm:$0xff]  ;;  %v446_v6 = vld [vmem:[#allocation2 + $0x20] sm:$0xff]  ;;  %v445_v8 = vld [vmem:[#allocation2 + $0x18] sm:$0xff] }
  0x10   :  { %v454_v7 = vld [vmem:[#allocation4 + $0x20] sm:$0xff]  ;;  %v444_v9 = vld [vmem:[#allocation2 + $0x10] sm:$0xff]  ;;  %v443_v10 = vld [vmem:[#allocation2 + $0x8] sm:$0xff] }
  0x11   :  { %v442_v11 = vld [vmem:[#allocation2] sm:$0xff]  ;;  %v453_v13 = vld [vmem:[#allocation4 + $0x18] sm:$0xff]  ;;  %v452_v14 = vld [vmem:[#allocation4 + $0x10] sm:$0xff] }
  0x12   :  { %150 = vmatpush.bf16.msra.mxu0 %v448_v1  ;;  %v441_v12 = vld [vmem:[%s622_s0] sm:$0xff]  ;;  %v451_v15 = vld [vmem:[#allocation4 + $0x8] sm:$0xff]  ;;  %v465_v17 = vld [vmem:[#allocation6 + $0x38] sm:$0xff] }
  0x13   :  { %235 = vmatpush.bf16.msra.mxu1 %v456_v3  ;;  %v450_v16 = vld [vmem:[#allocation4] sm:$0xff]  ;;  %319 = vmatpush.bf16.msra.mxu2 %v465_v17  ;;  %v464_v18 = vld [vmem:[#allocation6 + $0x30] sm:$0xff]  ;;  %v463_v19 = vld [vmem:[#allocation6 + $0x28] sm:$0xff] }
  0x14   :  { %v462_v20 = vld [vmem:[#allocation6 + $0x20] sm:$0xff]  ;;  %v461_v29 = vld [vmem:[#allocation6 + $0x18] sm:$0xff]  ;;  %v460_v30 = vld [vmem:[#allocation6 + $0x10] sm:$0xff] }
  0x15   :  { %v471_v22 = vld [vmem:[%s624_s2] ss:$0 sm:$0xff]  ;;  %v459_v31 = vld [vmem:[#allocation6 + $0x8] sm:$0xff] }
  0x16   :  { %151 = vmatpush.bf16.msra.mxu0 %v447_v4  ;;  %v458_v32 = vld [vmem:[#allocation6] sm:$0xff] }
  0x17   :  { %236 = vmatpush.bf16.msra.mxu1 %v455_v5  ;;  %320 = vmatpush.bf16.msra.mxu2 %v464_v18  ;;  %v472_v34 = vld [vmem:[%s626_s4] ss:$0 sm:$0xff] }
  0x18   :  { %v473_v41 = vld [vmem:[%s628_s6] ss:$0 sm:$0xff] }
  0x1a   :  { %152 = vmatpush.bf16.msra.mxu0 %v446_v6 }
  0x1b   :  { %237 = vmatpush.bf16.msra.mxu1 %v454_v7  ;;  %321 = vmatpush.bf16.msra.mxu2 %v463_v19 }
  0x1e   :  { %153 = vmatpush.bf16.msra.mxu0 %v445_v8 }
  0x1f   :  { %238 = vmatpush.bf16.msra.mxu1 %v453_v13  ;;  %322 = vmatpush.bf16.msra.mxu2 %v462_v20 }
  0x22   :  { %154 = vmatpush.bf16.msra.mxu0 %v444_v9 }
  0x23   :  { %239 = vmatpush.bf16.msra.mxu1 %v452_v14  ;;  %323 = vmatpush.bf16.msra.mxu2 %v461_v29 }
  0x26   :  { %155 = vmatpush.bf16.msra.mxu0 %v443_v10 }
  0x27   :  { %240 = vmatpush.bf16.msra.mxu1 %v451_v15  ;;  %324 = vmatpush.bf16.msra.mxu2 %v460_v30 }
  0x2a   :  { %156 = vmatpush.bf16.msra.mxu0 %v442_v11 }
  0x2b   :  { %241 = vmatpush.bf16.msra.mxu1 %v450_v16  ;;  %325 = vmatpush.bf16.msra.mxu2 %v459_v31 }
  0x2d   :  { %157 = vmatmul.bf16.vlgmr.msra.gmra.mxu0 %v441_v12 }
  0x2f   :  { %326 = vmatpush.bf16.msra.mxu2 %v458_v32 }
  0xaa   :  { %v158_v21 = vpop.f32.mrf.mxu0 }
  0xab   :  { %v159_v23 = vadd.f32 %v471_v22, %v158_v21 }
  0xad   :  { %v163_v26 = vmax.f32 %v159_v23, 0.0 }
  0xb2   :  { %v160_v24 = vpop.f32.mrf.mxu0 }
  0xb3   :  { %v161_v25 = vadd.f32 %v471_v22, %v160_v24 }
  0xb5   :  { %v164_v27 = vmax.f32 %v161_v25, 0.0 }
  0xb7   :  { %v165_v28 = vpack.c.bf16 %v164_v27, %v163_v26 }
  0xb9   :  { %242 = vmatmul.bf16.vlgmr.msra.gmra.mxu1 %v165_v28 }
 0x136   :  { %v243_v33 = vpop.f32.mrf.mxu1 }
 0x137   :  { %v244_v35 = vadd.f32 %v472_v34, %v243_v33 }
 0x139   :  { %v248_v38 = vmax.f32 %v244_v35, 0.0 }
 0x13e   :  { %v245_v36 = vpop.f32.mrf.mxu1 }
 0x13f   :  { %v246_v37 = vadd.f32 %v472_v34, %v245_v36 }
 0x141   :  { %v249_v39 = vmax.f32 %v246_v37, 0.0 }
 0x143   :  { %v250_v40 = vpack.c.bf16 %v249_v39, %v248_v38 }
 0x145   :  { %327 = vmatmul.bf16.vlgmr.msra.gmra.mxu2 %v250_v40 }
 0x1c8   :  { %v328_v42 = vpop.f32.mrf.mxu2 }
 0x1c9   :  { %v329_v43 = vadd.f32 %v473_v41, %v328_v42 }
 0x1cb   :  { %333 = vst [vmem:[%s629_s7] sm:$0xff] %v329_v43 }
 0x1d0   :  { %v330_v44 = vpop.f32.mrf.mxu2 }
 0x1d1   :  { %v331_v45 = vadd.f32 %v473_v41, %v330_v44 }
 0x1d3   :  { %334 = vst [vmem:[%s629_s7 + $0x8] sm:$0xff] %v331_v45 }
 0x1d4   :  { %339 = vsyncpa [#allocation3], 1 }
 0x1d5   :  { %340 = vsyncpa [#allocation5], 1 }

</bundles_post_ra>
